<compile_context>
chip_gen: v5e
topology: v5e:2x2
jax: 0.10.0
libtpu: 0.0.40
codegen_flags: <defaults>
</compile_context>

<pallas_src>
import jax
import jax.numpy as jnp
from jax.experimental import pallas as pl
from jax.experimental.pallas import tpu as pltpu


# ----------------------------- kernels ------------------------------------ #

def _td_linear_kernel_resident(x_ref, w_ref, scale_ref, shift_ref, o_ref):
    """Grid = (M/tm, F_out/tn); W covers the full K dim (resident), no scratch."""
    y = jnp.dot(x_ref[...], w_ref[...], preferred_element_type=jnp.float32)
    # Fused epilogue: Linear bias and eval-mode BN collapse to one per-feature
    # affine: y = (x @ W^T) * scale + shift   (f32, then cast once on store).
    o_ref[...] = (y * scale_ref[...] + shift_ref[...]).astype(o_ref.dtype)


def _td_linear_kernel_tiled(x_ref, w_ref, scale_ref, shift_ref, o_ref, acc_ref):
    """Grid = (M/tm, F_out/tn, F_in/tk); K axis (2) is the reduction."""
    k = pl.program_id(2)

    @pl.when(k == 0)
    def _():
        acc_ref[...] = jnp.zeros_like(acc_ref)

    acc_ref[...] += jnp.dot(x_ref[...], w_ref[...],
                            preferred_element_type=jnp.float32)

    @pl.when(k == pl.num_programs(2) - 1)
    def _():
        o_ref[...] = (acc_ref[...] * scale_ref[...]
                      + shift_ref[...]).astype(o_ref.dtype)


# --------------------------- tile selection -------------------------------- #

def _tile_candidates(dim, cands):
    """Divisor tiles from `cands` (descending), falling back to the full dim."""
    out = [c for c in cands if c <= dim and dim % c == 0]
    return out if out else [dim]


def _choose_config(M, F_in, F_out, in_elt, out_elt, budget, force_k_tiling):
    """Pick (mode, tm, tn, tk). mode 'resident' drops the K axis entirely."""
    q_m = 16 if in_elt == 2 else 8          # bf16 sublane packing -> 16
    tm_cands = _tile_candidates(M, tuple(t for t in (512, 256, 128, 64, 32, 16, 8)
                                         if t % q_m == 0))
    tn_cands = _tile_candidates(F_out, (512, 256, 128))
    tk_cands = _tile_candidates(F_in, (512, 256, 128))

    def bytes_needed(tm, tn, tk, with_acc):
        b = (2 * tm * tk * in_elt          # x tiles   (double-buffered)
             + 2 * tk * tn * in_elt        # W tiles   (double-buffered)
             + 2 * tm * tn * out_elt       # out tiles (double-buffered)
             + 4 * tn * 4)                 # scale + shift (f32)
        if with_acc:
            b += tm * tn * 4               # f32 accumulator scratch
        return b

    if not force_k_tiling:
        for tm in tm_cands:                # descending -> first fit = largest
            for tn in tn_cands:
                if bytes_needed(tm, tn, F_in, False) <= budget:
                    return "resident", tm, tn, F_in
    for tm in tm_cands:
        for tn in tn_cands:
            for tk in tk_cands:
                if bytes_needed(tm, tn, tk, True) <= budget:
                    return "tiled", tm, tn, tk
    # Last resort: smallest of everything (still correct; may spill).
    return "tiled", tm_cands[-1], tn_cands[-1], tk_cands[-1]


# ------------------------------ wrappers ----------------------------------- #

def td_linear_flat(x_flat, weight, bias, bn=None, *, compute_dtype=None,
                   force_k_tiling=False):
    """tdLayer(nn.Linear) on time-major-flattened input (preferred entry point).

    Args:
      x_flat: (M, F_in) where M = T*N (time-major flattening of all steps).
      weight: (F_out, F_in)  torch Linear layout.
      bias:   (F_out,)
      bn:     None, or dict(gamma, beta, mean, var, eps) = eval-mode BatchNorm.
      compute_dtype: dtype for the matmul operands (e.g. jnp.bfloat16 on
        v6e/v7x). Accumulation and epilogue stay f32. Default: x_flat.dtype.
      force_k_tiling: force the K-tiled accumulator path (for testing / huge K).
    Returns:
      (M, F_out) in x_flat.dtype.
    """
    M, F_in = x_flat.shape
    F_out, F_in_w = weight.shape
    assert F_in_w == F_in, "weight / input feature mismatch"
    if bn is not None and not isinstance(bn, dict):
        raise NotImplementedError(
            "Only inference-mode BN (dict of running stats) is supported.")

    out_dtype = x_flat.dtype
    cdt = compute_dtype or out_dtype

    # ---- fold bias (+ optional eval-mode BN) into one per-feature affine ----
    bias_f32 = bias.astype(jnp.float32)
    if bn is None:
        scale = jnp.ones((1, F_out), jnp.float32)
        shift = bias_f32.reshape(1, F_out)
    else:
        s = bn["gamma"].astype(jnp.float32) / jnp.sqrt(
            bn["var"].astype(jnp.float32) + bn["eps"])
        scale = s.reshape(1, F_out)
        shift = (s * (bias_f32 - bn["mean"].astype(jnp.float32))
                 + bn["beta"].astype(jnp.float32)).reshape(1, F_out)

    x_c = x_flat.astype(cdt)
    w_t = jnp.transpose(weight, (1, 0)).astype(cdt)        # (F_in, F_out)

    in_elt = jnp.dtype(cdt).itemsize
    out_elt = jnp.dtype(out_dtype).itemsize
    tile_budget = 40 * 1024 * 1024                          # headroom under limit
    vmem_limit = 48 * 1024 * 1024                           # safe on v7x (64 MiB)

    mode, tm, tn, tk = _choose_config(M, F_in, F_out, in_elt, out_elt,
                                      tile_budget, force_k_tiling)

    # v7x megacore: a fully collapsed 1-step grid leaves one TensorCore idle.
    # Split M only when each half is still MXU-sized (tiny problems keep the
    # single big step — that is faster than paying two grid steps).
    if mode == "resident" and M // tm == 1 and F_out // tn == 1 and tm >= 256:
        q_m = 16 if in_elt == 2 else 8
        if (tm // 2) % q_m == 0:
            tm //= 2

    if mode == "resident":
        grid = (M // tm, F_out // tn)
        out = pl.pallas_call(
            _td_linear_kernel_resident,
            out_shape=jax.ShapeDtypeStruct((M, F_out), out_dtype),
            grid_spec=pltpu.PrefetchScalarGridSpec(
                num_scalar_prefetch=0,
                grid=grid,
                in_specs=[
                    # x rows: (tm, full K)
                    pl.BlockSpec((tm, F_in), lambda i, j: (i, 0)),
                    # W: full K, tn lanes; constant in i -> stays resident.
                    pl.BlockSpec((F_in, tn), lambda i, j: (0, j)),
                    # per-output-feature affine params (feature tile only)
                    pl.BlockSpec((1, tn), lambda i, j: (0, j)),
                    pl.BlockSpec((1, tn), lambda i, j: (0, j)),
                ],
                out_specs=pl.BlockSpec((tm, tn), lambda i, j: (i, j)),
            ),
            compiler_params=pltpu.CompilerParams(
                dimension_semantics=("parallel", "parallel"),
                vmem_limit_bytes=vmem_limit,
            ),
        )(x_c, w_t, scale, shift)
    else:
        grid = (M // tm, F_out // tn, F_in // tk)
        out = pl.pallas_call(
            _td_linear_kernel_tiled,
            out_shape=jax.ShapeDtypeStruct((M, F_out), out_dtype),
            grid_spec=pltpu.PrefetchScalarGridSpec(
                num_scalar_prefetch=0,
                grid=grid,
                in_specs=[
                    pl.BlockSpec((tm, tk), lambda i, j, k: (i, k)),
                    pl.BlockSpec((tk, tn), lambda i, j, k: (k, j)),
                    pl.BlockSpec((1, tn), lambda i, j, k: (0, j)),
                    pl.BlockSpec((1, tn), lambda i, j, k: (0, j)),
                ],
                out_specs=pl.BlockSpec((tm, tn), lambda i, j, k: (i, j)),
                scratch_shapes=[pltpu.VMEM((tm, tn), jnp.float32)],
            ),
            compiler_params=pltpu.CompilerParams(
                # K reduction stays sequential; everything else is independent.
                dimension_semantics=("parallel", "parallel", "arbitrary"),
                vmem_limit_bytes=vmem_limit,
            ),
        )(x_c, w_t, scale, shift)
    return out


def td_linear(x, weight, bias, bn=None, **kw):
    """tdLayer(nn.Linear, bn) with the torch (N, F_in, T) layout.

    NOTE: the two boundary transposes below each cost an extra HBM round trip
    of the activation; in a multi-layer SNN keep activations time-major
    (T*N, F) and call td_linear_flat directly between layers.
    """
    N, F_in, T = x.shape
    F_out = weight.shape[0]
    x_flat = jnp.transpose(x, (2, 0, 1)).reshape(T * N, F_in)   # (T*N, F_in)
    out_flat = td_linear_flat(x_flat, weight, bias, bn=bn, **kw)
    return jnp.transpose(out_flat.reshape(T, N, F_out), (1, 2, 0))  # (N,F_out,T)


# ------------------------------ reference ---------------------------------- #

def _reference_td_layer(x, layer_fn, bn_fn=None):
    """Pure-JAX mirror of the PyTorch tdLayer.forward (loop over last dim)."""
    steps = x.shape[-1]
    outs = [layer_fn(x[..., s]) for s in range(steps)]
    y = jnp.stack(outs, axis=-1)
    if bn_fn is not None:
        y = bn_fn(y)
    return y


if __name__ == "__main__":
    # Shapes implied by the module: tdLayer wrapping the classifier-head Linear
    # of an SNN — per-step features = channels*spatial^2 = 4*16*16 = 1024,
    # hidden = 128 (multiple of 128 for lane-dense stores), T = 8, batch = 2.
    N, C, H, W, T = 2, 4, 16, 16, 8
    F_in = C * H * W          # 1024
    F_out = 128

    key = jax.random.PRNGKey(0)
    kx, kw, kb, kg, kbe, km, kv = jax.random.split(key, 7)

    x = jax.random.normal(kx, (N, F_in, T), jnp.float32)
    weight = jax.random.normal(kw, (F_out, F_in), jnp.float32) / jnp.sqrt(F_in)
    bias = 0.1 * jax.random.normal(kb, (F_out,), jnp.float32)
    bn = dict(
        gamma=jax.random.uniform(kg, (F_out,), jnp.float32, minval=0.5, maxval=1.5),
        beta=0.1 * jax.random.normal(kbe, (F_out,), jnp.float32),
        mean=0.1 * jax.random.normal(km, (F_out,), jnp.float32),
        var=jax.random.uniform(kv, (F_out,), jnp.float32, minval=0.5, maxval=1.5),
        eps=1e-5,
    )

    bn_fn = lambda y: (bn["gamma"][None, :, None]
                       * (y - bn["mean"][None, :, None])
                       / jnp.sqrt(bn["var"][None, :, None] + bn["eps"])
                       + bn["beta"][None, :, None])
    ref_bn = _reference_td_layer(x, lambda xs: xs @ weight.T + bias, bn_fn)
    ref_nobn = _reference_td_layer(x, lambda xs: xs @ weight.T + bias, None)

    # 1) default: f32, weight-resident path (no K axis, no accumulator).
    out = jax.block_until_ready(td_linear(x, weight, bias, bn=bn))
    assert out.shape == (N, F_out, T)
    assert jnp.allclose(out, ref_bn, atol=1e-4, rtol=1e-4), "resident path mismatch"

    # 2) forced K-tiled path (exercises accumulator + pl.when gating).
    out_k = jax.block_until_ready(
        td_linear(x, weight, bias, bn=bn, force_k_tiling=True))
    assert jnp.allclose(out_k, ref_bn, atol=1e-4, rtol=1e-4), "tiled path mismatch"

    # 3) bias-only (no BN) branch.
    out_nb = jax.block_until_ready(td_linear(x, weight, bias, bn=None))
    assert jnp.allclose(out_nb, ref_nobn, atol=1e-4, rtol=1e-4), "no-BN mismatch"

    # 4) bf16 operands (v6e/v7x MXU rate), f32 accumulation + epilogue.
    out_bf = jax.block_until_ready(
        td_linear(x, weight, bias, bn=bn, compute_dtype=jnp.bfloat16))
    assert jnp.allclose(out_bf, ref_bn, atol=1e-1, rtol=1e-1), "bf16 path mismatch"

    print("KERNEL_OK")
</pallas_src>

<mosaic_0001>
module attributes {stable_mosaic.version = 11 : i64} {
  func.func @_td_linear_kernel_resident(%arg0: i32, %arg1: i32, %arg2: memref<16x1024xf32, #tpu.memory_space<vmem>>, %arg3: memref<1024x128xf32, #tpu.memory_space<vmem>>, %arg4: memref<1x128xf32, #tpu.memory_space<vmem>>, %arg5: memref<1x128xf32, #tpu.memory_space<vmem>>, %arg6: memref<16x128xf32, #tpu.memory_space<vmem>>) attributes {dimension_semantics = [#tpu.dimension_semantics<parallel>, #tpu.dimension_semantics<parallel>], iteration_bounds = array<i64: 1, 1>, scalar_prefetch = 0 : i64, scratch_operands = 0 : i64, tpu.core_type = #tpu.core_type<tc>, window_params = [{transform_indices = @transform_0, window_bounds = array<i64: 16, 1024>}, {transform_indices = @transform_1, window_bounds = array<i64: 1024, 128>}, {transform_indices = @transform_2, window_bounds = array<i64: 1, 128>}, {transform_indices = @transform_3, window_bounds = array<i64: 1, 128>}, {transform_indices = @transform_4, window_bounds = array<i64: 16, 128>}]} {
    %c0 = arith.constant 0 : index
    %c0_0 = arith.constant 0 : index
    %0 = vector.load %arg2[%c0, %c0_0] : memref<16x1024xf32, #tpu.memory_space<vmem>>, vector<16x1024xf32>
    %c0_1 = arith.constant 0 : index
    %c0_2 = arith.constant 0 : index
    %1 = vector.load %arg3[%c0_1, %c0_2] : memref<1024x128xf32, #tpu.memory_space<vmem>>, vector<1024x128xf32>
    %cst = arith.constant dense<0.000000e+00> : vector<16x128xf32>
    %2 = tpu.matmul %0, %1, %cst {dimension_numbers = #tpu.dot_dimension_numbers<[1], [0], [0], [1], [0, 0, 1, 1], [], []>} : vector<16x1024xf32>, vector<1024x128xf32>, vector<16x128xf32> -> vector<16x128xf32>
    %c0_3 = arith.constant 0 : index
    %c0_4 = arith.constant 0 : index
    %3 = vector.load %arg4[%c0_3, %c0_4] : memref<1x128xf32, #tpu.memory_space<vmem>>, vector<1x128xf32>
    %4 = vector.broadcast %3 : vector<1x128xf32> to vector<16x128xf32>
    %5 = arith.mulf %2, %4 : vector<16x128xf32>
    %c0_5 = arith.constant 0 : index
    %c0_6 = arith.constant 0 : index
    %6 = vector.load %arg5[%c0_5, %c0_6] : memref<1x128xf32, #tpu.memory_space<vmem>>, vector<1x128xf32>
    %7 = vector.broadcast %6 : vector<1x128xf32> to vector<16x128xf32>
    %8 = arith.addf %5, %7 : vector<16x128xf32>
    %c0_7 = arith.constant 0 : index
    %c0_8 = arith.constant 0 : index
    %9 = vector.load %arg6[%c0_7, %c0_8] : memref<16x128xf32, #tpu.memory_space<vmem>>, vector<16x128xf32>
    tpu.vector_store %arg6[%c0_7, %c0_8], %8 {strides = array<i32>} : memref<16x128xf32, #tpu.memory_space<vmem>>, vector<16x128xf32>,
    return
  }
  func.func @transform_0(%arg0: i32, %arg1: i32) -> (i32, i32) {
    %c0_i32 = arith.constant 0 : i32
    %c0_i32_0 = arith.constant 0 : i32
    return %arg0, %c0_i32 : i32, i32
  }
  func.func @transform_1(%arg0: i32, %arg1: i32) -> (i32, i32) {
    %c0_i32 = arith.constant 0 : i32
    %c0_i32_0 = arith.constant 0 : i32
    return %c0_i32, %arg1 : i32, i32
  }
  func.func @transform_2(%arg0: i32, %arg1: i32) -> (i32, i32) {
    %c0_i32 = arith.constant 0 : i32
    %c0_i32_0 = arith.constant 0 : i32
    return %c0_i32, %arg1 : i32, i32
  }
  func.func @transform_3(%arg0: i32, %arg1: i32) -> (i32, i32) {
    %c0_i32 = arith.constant 0 : i32
    %c0_i32_0 = arith.constant 0 : i32
    return %c0_i32, %arg1 : i32, i32
  }
  func.func @transform_4(%arg0: i32, %arg1: i32) -> (i32, i32) {
    %c0_i32 = arith.constant 0 : i32
    return %arg0, %arg1 : i32, i32
  }
}

</mosaic_0001>

<bundles_post_ra>
// kernel: tpu_custom_call.1
= control target key start
LH: loop header
LB: loop body
LE: loop exit
PB: predicated region body
PF: predicated region fallthrough
CT: control target
= control target key end

     0   :  { %9 = vsyncpa [#allocation3], 0  ;;  %s552_s0 = inlined_call_operand.hbm [shape: f32[16,1024], index: 0, kind: input, shape index: {}]   ;;  %s553_s1 = inlined_call_operand.hbm [shape: f32[1024,128], index: 1, kind: input, shape index: {}]   ;;  %s554_s2 = inlined_call_operand.vmem [shape: f32[1,128], index: 2, kind: input, shape index: {}]   ;;  %s555_s3 = inlined_call_operand.vmem [shape: f32[1,128], index: 3, kind: input, shape index: {}]   ;;  %s556_s4 = inlined_call_operand.hbm [shape: f32[16,128], index: 4, kind: output, shape index: {}]  }
   0x1   :  { %10 = vsyncpa [#allocation6], 0 }
   0x2   :  { %11 = vsyncpa [#allocation4], 0  ;;  %s16_s17 = sshll.u32 %s552_s0, 4  ;;  %s499_s18 = smov [#allocation2]   ;;  %s17_s17 = int_to_ptr.hbm [resolvable:$true] %s16_s17 }
   0x3   :  { %s18_s19 = sshll.u32 %s499_s18, 4  ;;  %s29_s22 = sshll.u32 %s553_s1, 4  ;;  %s19_s19 = int_to_ptr.vmem [resolvable:$true] %s18_s19  ;;  %s30_s22 = int_to_ptr.hbm [resolvable:$true] %s29_s22 }
   0x4   :  { %s500_s23 = smov 1024   ;;  %s501_s24 = smov 64  }
   0x5   :  { %24 = dma.hbm_to_vmem [thread:$0]  %s17_s17, 2048, %s19_s19, [#allocation3], %s500_s23, %s500_s23, %s501_s24  }
   0x6   :  { %s502_s25 = smov [#allocation5]   ;;  %s503_s27 = smov 128  }
   0x7   :  { %s31_s26 = sshll.u32 %s502_s25, 4  ;;  %s504_s28 = smov 8   ;;  %s32_s26 = int_to_ptr.vmem [resolvable:$true] %s31_s26 }
   0x8   :  { %37 = dma.hbm_to_vmem [thread:$0]  %s30_s22, 16384, %s32_s26, [#allocation6], %s503_s27, %s503_s27, %s504_s28  }
   0x9   :  { %493 = dma.done.wait [#allocation3], 2048  }
   0xa   :  { %494 = vsyncadd [#allocation3], 4294965248 }
   0xb   :  { %495 = dma.done.wait [#allocation6], 16384  }
   0xc   :  { %496 = vsyncadd [#allocation6], 4294950912  ;;  %v81_v0 = vld [vmem:[#allocation5 + $0x78] sm:$0xff]  ;;  %v80_v2 = vld [vmem:[#allocation5 + $0x70] sm:$0xff]  ;;  %s505_s5 = smov [#allocation7]   ;;  %s398_s8 = sshll.u32 %s556_s4, 4  ;;  %s399_s8 = int_to_ptr.hbm [resolvable:$true] %s398_s8 }
   0xd   :  { %v113_v1 = vld [vmem:[#allocation5 + $0x178] sm:$0xff]  ;;  %194 = vmatpush.msra.mxu0 %v81_v0  ;;  %v112_v4 = vld [vmem:[#allocation5 + $0x170] sm:$0xff]  ;;  %v79_v6 = vld [vmem:[#allocation5 + $0x68] sm:$0xff]  ;;  %s396_s6 = sshll.u32 %s505_s5, 4  ;;  %s397_s6 = int_to_ptr.vmem [resolvable:$true] %s396_s6 }
   0xe   :  { %240 = vmatpush.msra.mxu2 %v113_v1  ;;  %v97_v3 = vld [vmem:[#allocation5 + $0xf8] sm:$0xff]  ;;  %v96_v7 = vld [vmem:[#allocation5 + $0xf0] sm:$0xff]  ;;  %v111_v8 = vld [vmem:[#allocation5 + $0x168] sm:$0xff] }
   0xf   :  { %v129_v5 = vld [vmem:[#allocation5 + $0x1f8] sm:$0xff]  ;;  %217 = vmatpush.msra.mxu1 %v97_v3  ;;  %195 = vmatpush.msra.mxu0 %v80_v2  ;;  %v128_v9 = vld [vmem:[#allocation5 + $0x1f0] sm:$0xff]  ;;  %v95_v10 = vld [vmem:[#allocation5 + $0xe8] sm:$0xff] }
  0x10   :  { %263 = vmatpush.msra.mxu3 %v129_v5  ;;  %241 = vmatpush.msra.mxu2 %v112_v4  ;;  %v78_v11 = vld [vmem:[#allocation5 + $0x60] sm:$0xff]  ;;  %v127_v13 = vld [vmem:[#allocation5 + $0x1e8] sm:$0xff]  ;;  %v77_v16 = vld [vmem:[#allocation5 + $0x58] sm:$0xff] }
  0x11   :  { %218 = vmatpush.msra.mxu1 %v96_v7  ;;  %v110_v12 = vld [vmem:[#allocation5 + $0x160] sm:$0xff]  ;;  %196 = vmatpush.msra.mxu0 %v79_v6  ;;  %v109_v17 = vld [vmem:[#allocation5 + $0x158] sm:$0xff]  ;;  %v76_v20 = vld [vmem:[#allocation5 + $0x50] sm:$0xff] }
  0x12   :  { %264 = vmatpush.msra.mxu3 %v128_v9  ;;  %242 = vmatpush.msra.mxu2 %v111_v8  ;;  %v94_v14 = vld [vmem:[#allocation5 + $0xe0] sm:$0xff]  ;;  %v93_v18 = vld [vmem:[#allocation5 + $0xd8] sm:$0xff]  ;;  %v108_v21 = vld [vmem:[#allocation5 + $0x150] sm:$0xff] }
  0x13   :  { %v126_v15 = vld [vmem:[#allocation5 + $0x1e0] sm:$0xff]  ;;  %219 = vmatpush.msra.mxu1 %v95_v10  ;;  %197 = vmatpush.msra.mxu0 %v78_v11  ;;  %v125_v19 = vld [vmem:[#allocation5 + $0x1d8] sm:$0xff]  ;;  %v92_v22 = vld [vmem:[#allocation5 + $0xd0] sm:$0xff] }
  0x14   :  { %265 = vmatpush.msra.mxu3 %v127_v13  ;;  %243 = vmatpush.msra.mxu2 %v110_v12  ;;  %v124_v23 = vld [vmem:[#allocation5 + $0x1d0] sm:$0xff]  ;;  %v75_v24 = vld [vmem:[#allocation5 + $0x48] sm:$0xff]  ;;  %v74_v28 = vld [vmem:[#allocation5 + $0x40] sm:$0xff] }
  0x15   :  { %220 = vmatpush.msra.mxu1 %v94_v14  ;;  %198 = vmatpush.msra.mxu0 %v77_v16  ;;  %v107_v25 = vld [vmem:[#allocation5 + $0x148] sm:$0xff]  ;;  %v106_v29 = vld [vmem:[#allocation5 + $0x140] sm:$0xff]  ;;  %v73_v32 = vld [vmem:[#allocation5 + $0x38] sm:$0xff] }
  0x16   :  { %266 = vmatpush.msra.mxu3 %v126_v15  ;;  %244 = vmatpush.msra.mxu2 %v109_v17  ;;  %v91_v26 = vld [vmem:[#allocation5 + $0xc8] sm:$0xff]  ;;  %v90_v30 = vld [vmem:[#allocation5 + $0xc0] sm:$0xff]  ;;  %v105_v33 = vld [vmem:[#allocation5 + $0x138] sm:$0xff] }
  0x17   :  { %221 = vmatpush.msra.mxu1 %v93_v18  ;;  %199 = vmatpush.msra.mxu0 %v76_v20  ;;  %v123_v27 = vld [vmem:[#allocation5 + $0x1c8] sm:$0xff]  ;;  %v122_v31 = vld [vmem:[#allocation5 + $0x1c0] sm:$0xff]  ;;  %v89_v34 = vld [vmem:[#allocation5 + $0xb8] sm:$0xff] }
  0x18   :  { %267 = vmatpush.msra.mxu3 %v125_v19  ;;  %245 = vmatpush.msra.mxu2 %v108_v21  ;;  %v121_v35 = vld [vmem:[#allocation5 + $0x1b8] sm:$0xff]  ;;  %v72_v36 = vld [vmem:[#allocation5 + $0x30] sm:$0xff]  ;;  %v71_v40 = vld [vmem:[#allocation5 + $0x28] sm:$0xff] }
  0x19   :  { %222 = vmatpush.msra.mxu1 %v92_v22  ;;  %200 = vmatpush.msra.mxu0 %v75_v24  ;;  %v104_v37 = vld [vmem:[#allocation5 + $0x130] sm:$0xff]  ;;  %v103_v41 = vld [vmem:[#allocation5 + $0x128] sm:$0xff]  ;;  %v70_v44 = vld [vmem:[#allocation5 + $0x20] sm:$0xff] }
  0x1a   :  { %268 = vmatpush.msra.mxu3 %v124_v23  ;;  %246 = vmatpush.msra.mxu2 %v107_v25  ;;  %v88_v38 = vld [vmem:[#allocation5 + $0xb0] sm:$0xff]  ;;  %v87_v42 = vld [vmem:[#allocation5 + $0xa8] sm:$0xff]  ;;  %v102_v45 = vld [vmem:[#allocation5 + $0x120] sm:$0xff] }
  0x1b   :  { %223 = vmatpush.msra.mxu1 %v91_v26  ;;  %201 = vmatpush.msra.mxu0 %v74_v28  ;;  %v120_v39 = vld [vmem:[#allocation5 + $0x1b0] sm:$0xff]  ;;  %v119_v43 = vld [vmem:[#allocation5 + $0x1a8] sm:$0xff]  ;;  %v86_v46 = vld [vmem:[#allocation5 + $0xa0] sm:$0xff] }
  0x1c   :  { %269 = vmatpush.msra.mxu3 %v123_v27  ;;  %247 = vmatpush.msra.mxu2 %v106_v29  ;;  %v118_v47 = vld [vmem:[#allocation5 + $0x1a0] sm:$0xff]  ;;  %v69_v48 = vld [vmem:[#allocation5 + $0x18] sm:$0xff]  ;;  %v68_v52 = vld [vmem:[#allocation5 + $0x10] sm:$0xff] }
  0x1d   :  { %224 = vmatpush.msra.mxu1 %v90_v30  ;;  %202 = vmatpush.msra.mxu0 %v73_v32  ;;  %v101_v49 = vld [vmem:[#allocation5 + $0x118] sm:$0xff]  ;;  %v100_v53 = vld [vmem:[#allocation5 + $0x110] sm:$0xff]  ;;  %v67_v56 = vld [vmem:[#allocation5 + $0x8] sm:$0xff] }
  0x1e   :  { %270 = vmatpush.msra.mxu3 %v122_v31  ;;  %248 = vmatpush.msra.mxu2 %v105_v33  ;;  %v85_v50 = vld [vmem:[#allocation5 + $0x98] sm:$0xff]  ;;  %v84_v54 = vld [vmem:[#allocation5 + $0x90] sm:$0xff]  ;;  %v99_v57 = vld [vmem:[#allocation5 + $0x108] sm:$0xff] }
  0x1f   :  { %225 = vmatpush.msra.mxu1 %v89_v34  ;;  %203 = vmatpush.msra.mxu0 %v72_v36  ;;  %v117_v51 = vld [vmem:[#allocation5 + $0x198] sm:$0xff]  ;;  %v116_v55 = vld [vmem:[#allocation5 + $0x190] sm:$0xff]  ;;  %v83_v58 = vld [vmem:[#allocation5 + $0x88] sm:$0xff] }
  0x20   :  { %271 = vmatpush.msra.mxu3 %v121_v35  ;;  %249 = vmatpush.msra.mxu2 %v104_v37  ;;  %v115_v59 = vld [vmem:[#allocation5 + $0x188] sm:$0xff]  ;;  %v66_v60 = vld [vmem:[#allocation5] sm:$0xff]  ;;  %v145_v62 = vld [vmem:[#allocation5 + $0x278] sm:$0xff] }
  0x21   :  { %226 = vmatpush.msra.mxu1 %v88_v38  ;;  %204 = vmatpush.msra.mxu0 %v71_v40  ;;  %v98_v61 = vld [vmem:[#allocation5 + $0x100] sm:$0xff]  ;;  %v177_v63 = vld [vmem:[#allocation5 + $0x378] sm:$0xff]  ;;  %v144_v2 = vld [vmem:[#allocation5 + $0x270] sm:$0xff] }
  0x22   :  { %272 = vmatpush.msra.mxu3 %v120_v39  ;;  %250 = vmatpush.msra.mxu2 %v103_v41  ;;  %v82_v0 = vld [vmem:[#allocation5 + $0x80] sm:$0xff]  ;;  %v161_v3 = vld [vmem:[#allocation5 + $0x2f8] sm:$0xff]  ;;  %v176_v4 = vld [vmem:[#allocation5 + $0x370] sm:$0xff] }
  0x23   :  { %227 = vmatpush.msra.mxu1 %v87_v42  ;;  %205 = vmatpush.msra.mxu0 %v70_v44  ;;  %v114_v1 = vld [vmem:[#allocation5 + $0x180] sm:$0xff]  ;;  %v193_v5 = vld [vmem:[#allocation5 + $0x3f8] sm:$0xff]  ;;  %v143_v6 = vld [vmem:[#allocation5 + $0x268] sm:$0xff] }
  0x24   :  { %273 = vmatpush.msra.mxu3 %v119_v43  ;;  %251 = vmatpush.msra.mxu2 %v102_v45  ;;  %v160_v7 = vld [vmem:[#allocation5 + $0x2f0] sm:$0xff]  ;;  %v175_v8 = vld [vmem:[#allocation5 + $0x368] sm:$0xff]  ;;  %v142_v10 = vld [vmem:[#allocation5 + $0x260] sm:$0xff] }
  0x25   :  { %228 = vmatpush.msra.mxu1 %v86_v46  ;;  %206 = vmatpush.msra.mxu0 %v69_v48  ;;  %v192_v9 = vld [vmem:[#allocation5 + $0x3f0] sm:$0xff]  ;;  %v159_v11 = vld [vmem:[#allocation5 + $0x2e8] sm:$0xff]  ;;  %v174_v12 = vld [vmem:[#allocation5 + $0x360] sm:$0xff] }
  0x26   :  { %274 = vmatpush.msra.mxu3 %v118_v47  ;;  %252 = vmatpush.msra.mxu2 %v101_v49  ;;  %v191_v13 = vld [vmem:[#allocation5 + $0x3e8] sm:$0xff]  ;;  %v141_v14 = vld [vmem:[#allocation5 + $0x258] sm:$0xff]  ;;  %v158_v15 = vld [vmem:[#allocation5 + $0x2e0] sm:$0xff] }
  0x27   :  { %229 = vmatpush.msra.mxu1 %v85_v50  ;;  %207 = vmatpush.msra.mxu0 %v68_v52  ;;  %v173_v16 = vld [vmem:[#allocation5 + $0x358] sm:$0xff]  ;;  %v190_v17 = vld [vmem:[#allocation5 + $0x3e0] sm:$0xff]  ;;  %v140_v18 = vld [vmem:[#allocation5 + $0x250] sm:$0xff] }
  0x28   :  { %275 = vmatpush.msra.mxu3 %v117_v51  ;;  %253 = vmatpush.msra.mxu2 %v100_v53  ;;  %v157_v19 = vld [vmem:[#allocation5 + $0x2d8] sm:$0xff]  ;;  %v172_v20 = vld [vmem:[#allocation5 + $0x350] sm:$0xff]  ;;  %v139_v22 = vld [vmem:[#allocation5 + $0x248] sm:$0xff] }
  0x29   :  { %230 = vmatpush.msra.mxu1 %v84_v54  ;;  %208 = vmatpush.msra.mxu0 %v67_v56  ;;  %v189_v21 = vld [vmem:[#allocation5 + $0x3d8] sm:$0xff]  ;;  %v156_v23 = vld [vmem:[#allocation5 + $0x2d0] sm:$0xff]  ;;  %v171_v24 = vld [vmem:[#allocation5 + $0x348] sm:$0xff] }
  0x2a   :  { %276 = vmatpush.msra.mxu3 %v116_v55  ;;  %254 = vmatpush.msra.mxu2 %v99_v57  ;;  %v188_v25 = vld [vmem:[#allocation5 + $0x3d0] sm:$0xff]  ;;  %v138_v27 = vld [vmem:[#allocation5 + $0x240] sm:$0xff]  ;;  %v155_v28 = vld [vmem:[#allocation5 + $0x2c8] sm:$0xff] }
  0x2b   :  { %231 = vmatpush.msra.mxu1 %v83_v58  ;;  %209 = vmatpush.msra.mxu0 %v66_v60  ;;  %v52_v26 = vld [vmem:[#allocation2 + $0x10] sm:$0xff]  ;;  %v170_v29 = vld [vmem:[#allocation5 + $0x340] sm:$0xff]  ;;  %v187_v30 = vld [vmem:[#allocation5 + $0x3c8] sm:$0xff] }
  0x2c   :  { %277 = vmatpush.msra.mxu3 %v115_v59  ;;  %255 = vmatpush.msra.mxu2 %v98_v61  ;;  %v50_v31 = vld [vmem:[#allocation2] sm:$0xff]  ;;  %v53_v32 = vld [vmem:[#allocation2 + $0x18] sm:$0xff]  ;;  %v51_v37 = vld [vmem:[#allocation2 + $0x8] sm:$0xff] }
  0x2d   :  { %286 = vmatpush.msrb.mxu0 %v145_v62  ;;  %232 = vmatpush.msra.mxu1 %v82_v0  ;;  %v137_v33 = vld [vmem:[#allocation5 + $0x238] sm:$0xff]  ;;  %v154_v34 = vld [vmem:[#allocation5 + $0x2c0] sm:$0xff]  ;;  %v136_v38 = vld [vmem:[#allocation5 + $0x230] sm:$0xff] }
  0x2e   :  { %332 = vmatpush.msrb.mxu2 %v177_v63  ;;  %278 = vmatpush.msra.mxu3 %v114_v1  ;;  %v169_v35 = vld [vmem:[#allocation5 + $0x338] sm:$0xff]  ;;  %v186_v36 = vld [vmem:[#allocation5 + $0x3c0] sm:$0xff]  ;;  %v168_v40 = vld [vmem:[#allocation5 + $0x330] sm:$0xff] }
  0x2f   :  { %287 = vmatpush.msrb.mxu0 %v144_v2  ;;  %309 = vmatpush.msrb.mxu1 %v161_v3  ;;  %v153_v39 = vld [vmem:[#allocation5 + $0x2b8] sm:$0xff]  ;;  %v135_v42 = vld [vmem:[#allocation5 + $0x228] sm:$0xff]  ;;  %v152_v43 = vld [vmem:[#allocation5 + $0x2b0] sm:$0xff] }
  0x30   :  { %333 = vmatpush.msrb.mxu2 %v176_v4  ;;  %355 = vmatpush.msrb.mxu3 %v193_v5  ;;  %v185_v41 = vld [vmem:[#allocation5 + $0x3b8] sm:$0xff]  ;;  %v167_v44 = vld [vmem:[#allocation5 + $0x328] sm:$0xff]  ;;  %v184_v45 = vld [vmem:[#allocation5 + $0x3b0] sm:$0xff] }
  0x31   :  { %288 = vmatpush.msrb.mxu0 %v143_v6  ;;  %310 = vmatpush.msrb.mxu1 %v160_v7  ;;  %v60_v46 = vld [vmem:[#allocation2 + $0x50] sm:$0xff]  ;;  %v134_v47 = vld [vmem:[#allocation5 + $0x220] sm:$0xff]  ;;  %v151_v48 = vld [vmem:[#allocation5 + $0x2a8] sm:$0xff] }
  0x32   :  { %334 = vmatpush.msrb.mxu2 %v175_v8  ;;  %356 = vmatpush.msrb.mxu3 %v192_v9  ;;  %v166_v49 = vld [vmem:[#allocation5 + $0x320] sm:$0xff]  ;;  %v183_v50 = vld [vmem:[#allocation5 + $0x3a8] sm:$0xff]  ;;  %v61_v52 = vld [vmem:[#allocation2 + $0x58] sm:$0xff] }
  0x33   :  { %289 = vmatpush.msrb.mxu0 %v142_v10  ;;  %311 = vmatpush.msrb.mxu1 %v159_v11  ;;  %v58_v51 = vld [vmem:[#allocation2 + $0x40] sm:$0xff]  ;;  %v133_v53 = vld [vmem:[#allocation5 + $0x218] sm:$0xff]  ;;  %v59_v57 = vld [vmem:[#allocation2 + $0x48] sm:$0xff] }
  0x34   :  { %335 = vmatpush.msrb.mxu2 %v174_v12  ;;  %357 = vmatpush.msrb.mxu3 %v191_v13  ;;  %v150_v54 = vld [vmem:[#allocation5 + $0x2a0] sm:$0xff]  ;;  %v165_v55 = vld [vmem:[#allocation5 + $0x318] sm:$0xff]  ;;  %v132_v58 = vld [vmem:[#allocation5 + $0x210] sm:$0xff] }
  0x35   :  { %290 = vmatpush.msrb.mxu0 %v141_v14  ;;  %312 = vmatpush.msrb.mxu1 %v158_v15  ;;  %v182_v56 = vld [vmem:[#allocation5 + $0x3a0] sm:$0xff]  ;;  %v149_v59 = vld [vmem:[#allocation5 + $0x298] sm:$0xff]  ;;  %v164_v60 = vld [vmem:[#allocation5 + $0x310] sm:$0xff] }
  0x36   :  { %336 = vmatpush.msrb.mxu2 %v173_v16  ;;  %358 = vmatpush.msrb.mxu3 %v190_v17  ;;  %v181_v61 = vld [vmem:[#allocation5 + $0x398] sm:$0xff]  ;;  %v131_v62 = vld [vmem:[#allocation5 + $0x208] sm:$0xff]  ;;  %v148_v63 = vld [vmem:[#allocation5 + $0x290] sm:$0xff] }
  0x37   :  { %291 = vmatpush.msrb.mxu0 %v140_v18  ;;  %313 = vmatpush.msrb.mxu1 %v157_v19  ;;  %v163_v0 = vld [vmem:[#allocation5 + $0x308] sm:$0xff]  ;;  %v180_v1 = vld [vmem:[#allocation5 + $0x390] sm:$0xff]  ;;  %v130_v2 = vld [vmem:[#allocation5 + $0x200] sm:$0xff] }
  0x38   :  { %337 = vmatpush.msrb.mxu2 %v172_v20  ;;  %359 = vmatpush.msrb.mxu3 %v189_v21  ;;  %v147_v3 = vld [vmem:[#allocation5 + $0x288] sm:$0xff]  ;;  %v162_v4 = vld [vmem:[#allocation5 + $0x300] sm:$0xff]  ;;  %v56_v7 = vld [vmem:[#allocation2 + $0x30] sm:$0xff] }
  0x39   :  { %292 = vmatpush.msrb.mxu0 %v139_v22  ;;  %314 = vmatpush.msrb.mxu1 %v156_v23  ;;  %v179_v5 = vld [vmem:[#allocation5 + $0x388] sm:$0xff]  ;;  %v54_v6 = vld [vmem:[#allocation2 + $0x20] sm:$0xff]  ;;  %v57_v11 = vld [vmem:[#allocation2 + $0x38] sm:$0xff] }
  0x3a   :  { %338 = vmatpush.msrb.mxu2 %v171_v24  ;;  %360 = vmatpush.msrb.mxu3 %v188_v25  ;;  %v146_v8 = vld [vmem:[#allocation5 + $0x280] sm:$0xff]  ;;  %v55_v10 = vld [vmem:[#allocation2 + $0x28] sm:$0xff]  ;;  %v64_v13 = vld [vmem:[#allocation2 + $0x70] sm:$0xff] }
  0x3b   :  { %256 = vmatmul.f32.vlgmr.msra.gmra.mxu2 %v52_v26  ;;  %293 = vmatpush.msrb.mxu0 %v138_v27  ;;  %v178_v9 = vld [vmem:[#allocation5 + $0x380] sm:$0xff]  ;;  %v63_v14 = vld [vmem:[#allocation2 + $0x68] sm:$0xff]  ;;  %v65_v15 = vld [vmem:[#allocation2 + $0x78] sm:$0xff] }
  0x3c   :  { %315 = vmatpush.msrb.mxu1 %v155_v28  ;;  %339 = vmatpush.msrb.mxu2 %v170_v29  ;;  %v62_v12 = vld [vmem:[#allocation2 + $0x60] sm:$0xff] }
  0x3d   :  { %361 = vmatpush.msrb.mxu3 %v187_v30  ;;  %210 = vmatmul.f32.vlgmr.msra.gmra.mxu0 %v50_v31 }
  0x3e   :  { %279 = vmatmul.f32.vlgmr.msra.gmra.mxu3 %v53_v32  ;;  %294 = vmatpush.msrb.mxu0 %v137_v33 }
  0x3f   :  { %316 = vmatpush.msrb.mxu1 %v154_v34  ;;  %340 = vmatpush.msrb.mxu2 %v169_v35 }
  0x40   :  { %362 = vmatpush.msrb.mxu3 %v186_v36  ;;  %233 = vmatmul.f32.vlgmr.msra.gmra.mxu1 %v51_v37  ;;  %v419_v36 = vld [vmem:[%s554_s2] ss:$0 sm:$0xff] }
  0x41   :  { %295 = vmatpush.msrb.mxu0 %v136_v38  ;;  %317 = vmatpush.msrb.mxu1 %v153_v39 }
  0x42   :  { %341 = vmatpush.msrb.mxu2 %v168_v40  ;;  %363 = vmatpush.msrb.mxu3 %v185_v41  ;;  %v420_v41 = vld [vmem:[%s555_s3] ss:$0 sm:$0xff] }
  0x43   :  { %296 = vmatpush.msrb.mxu0 %v135_v42  ;;  %318 = vmatpush.msrb.mxu1 %v152_v43 }
  0x44   :  { %342 = vmatpush.msrb.mxu2 %v167_v44  ;;  %364 = vmatpush.msrb.mxu3 %v184_v45 }
  0x45   :  { %259 = vmatmul.f32.gmra.mxu2 %v60_v46  ;;  %297 = vmatpush.msrb.mxu0 %v134_v47 }
  0x46   :  { %319 = vmatpush.msrb.mxu1 %v151_v48  ;;  %343 = vmatpush.msrb.mxu2 %v166_v49 }
  0x47   :  { %365 = vmatpush.msrb.mxu3 %v183_v50  ;;  %213 = vmatmul.f32.gmra.mxu0 %v58_v51 }
  0x48   :  { %282 = vmatmul.f32.gmra.mxu3 %v61_v52  ;;  %298 = vmatpush.msrb.mxu0 %v133_v53 }
  0x49   :  { %320 = vmatpush.msrb.mxu1 %v150_v54  ;;  %344 = vmatpush.msrb.mxu2 %v165_v55 }
  0x4a   :  { %366 = vmatpush.msrb.mxu3 %v182_v56  ;;  %236 = vmatmul.f32.gmra.mxu1 %v59_v57 }
  0x4b   :  { %299 = vmatpush.msrb.mxu0 %v132_v58  ;;  %321 = vmatpush.msrb.mxu1 %v149_v59 }
  0x4c   :  { %345 = vmatpush.msrb.mxu2 %v164_v60  ;;  %367 = vmatpush.msrb.mxu3 %v181_v61 }
  0x4d   :  { %300 = vmatpush.msrb.mxu0 %v131_v62  ;;  %322 = vmatpush.msrb.mxu1 %v148_v63 }
  0x4e   :  { %346 = vmatpush.msrb.mxu2 %v163_v0  ;;  %368 = vmatpush.msrb.mxu3 %v180_v1 }
  0x4f   :  { %301 = vmatpush.msrb.mxu0 %v130_v2  ;;  %323 = vmatpush.msrb.mxu1 %v147_v3 }
  0x50   :  { %347 = vmatpush.msrb.mxu2 %v162_v4  ;;  %369 = vmatpush.msrb.mxu3 %v179_v5 }
  0x51   :  { %302 = vmatmul.f32.vlgmr.msrb.gmra.mxu0 %v54_v6  ;;  %348 = vmatmul.f32.vlgmr.msrb.gmra.mxu2 %v56_v7 }
  0x52   :  { %324 = vmatpush.msrb.mxu1 %v146_v8  ;;  %370 = vmatpush.msrb.mxu3 %v178_v9 }
  0x53   :  { %325 = vmatmul.f32.vlgmr.msrb.gmra.mxu1 %v55_v10  ;;  %371 = vmatmul.f32.vlgmr.msrb.gmra.mxu3 %v57_v11 }
  0x59   :  { %305 = vmatmul.f32.gmra.mxu0 %v62_v12  ;;  %351 = vmatmul.f32.gmra.mxu2 %v64_v13 }
  0x5b   :  { %328 = vmatmul.f32.gmra.mxu1 %v63_v14  ;;  %374 = vmatmul.f32.gmra.mxu3 %v65_v15 }
  0xba   :  { %v211_v16 = vpop.f32.mrf.mxu0 }
  0xbd   :  { %v234_v17 = vpop.f32.mrf.mxu1 }
  0xbe   :  { %v257_v18 = vpop.f32.mrf.mxu2  ;;  %v235_v21 = vadd.f32 %v234_v17, %v211_v16 }
  0xc0   :  { %v258_v23 = vadd.f32 %v257_v18, %v235_v21 }
  0xc1   :  { %v280_v19 = vpop.f32.mrf.mxu3 }
  0xc2   :  { %v281_v25 = vadd.f32 %v280_v19, %v258_v23 }
  0xc4   :  { %v214_v20 = vpop.f32.mrf.mxu0 }
  0xc7   :  { %v237_v22 = vpop.f32.mrf.mxu1 }
  0xc8   :  { %v260_v24 = vpop.f32.mrf.mxu2  ;;  %v238_v26 = vadd.f32 %v237_v22, %v214_v20 }
  0xca   :  { %v261_v31 = vadd.f32 %v260_v24, %v238_v26 }
  0xcb   :  { %v283_v27 = vpop.f32.mrf.mxu3 }
  0xcc   :  { %v284_v34 = vadd.f32 %v283_v27, %v261_v31 }
  0xce   :  { %v303_v28 = vpop.f32.mrf.mxu0 }
  0xcf   :  { %v304_v29 = vadd.f32 %v303_v28, %v281_v25 }
  0xd0   :  { %v326_v30 = vpop.f32.mrf.mxu1 }
  0xd1   :  { %v327_v32 = vadd.f32 %v326_v30, %v304_v29 }
  0xd4   :  { %v349_v33 = vpop.f32.mrf.mxu2 }
  0xd5   :  { %v350_v35 = vadd.f32 %v349_v33, %v327_v32 }
  0xd6   :  { %v306_v37 = vpop.f32.mrf.mxu0  ;;  %v372_v38 = vpop.f32.mrf.mxu3 }
  0xd7   :  { %v307_v39 = vadd.f32 %v306_v37, %v284_v34  ;;  %v373_v40 = vadd.f32 %v372_v38, %v350_v35 }
  0xd8   :  { %v329_v42 = vpop.f32.mrf.mxu1 }
  0xd9   :  { %v382_v43 = vmul.f32 %v419_v36, %v373_v40  ;;  %v330_v45 = vadd.f32 %v329_v42, %v307_v39 }
  0xdb   :  { %v388_v44 = vadd.f32 %v420_v41, %v382_v43 }
  0xdc   :  { %v352_v46 = vpop.f32.mrf.mxu2 }
  0xdd   :  { %390 = vst [vmem:[#allocation7] sm:$0xff] %v388_v44  ;;  %v353_v47 = vadd.f32 %v352_v46, %v330_v45 }
  0xde   :  { %v375_v48 = vpop.f32.mrf.mxu3 }
  0xdf   :  { %v376_v49 = vadd.f32 %v375_v48, %v353_v47 }
  0xe1   :  { %v383_v50 = vmul.f32 %v419_v36, %v376_v49 }
  0xe3   :  { %v389_v51 = vadd.f32 %v420_v41, %v383_v50 }
  0xe5   :  { %391 = vst [vmem:[#allocation7 + $0x8] sm:$0xff] %v389_v51 }
  0xe6   :  { %404 = dma.vmem_to_hbm [thread:$0]  %s397_s6, 256, %s399_s8, [#allocation4], %s503_s27, %s503_s27, %s504_s28  }
  0xe7   :  { %497 = dma.done.wait [#allocation4], 256  }
  0xe8   :  { %498 = vsyncadd [#allocation4], 4294967040 }
  0xe9   :  { %409 = vsyncpa [#allocation3], 1 }
  0xea   :  { %410 = vsyncpa [#allocation6], 1 }
  0xeb   :  { %411 = vsyncpa [#allocation4], 1 }

</bundles_post_ra>
